<compile_context>
chip_gen: v7x
topology: tpu7x:2x2x1
jax: 0.10.0
libtpu: 0.0.40
codegen_flags: <defaults>
</compile_context>

<pallas_src>
import functools

import jax
import jax.numpy as jnp
from jax.experimental import pallas as pl
from jax.experimental.pallas import tpu as pltpu

_MXU_DTYPE = jnp.bfloat16  # MXU operand dtype; accumulation is always float32.


# --------------------------- hardware-aware sizing -------------------------- #

@functools.lru_cache(maxsize=None)
def _vmem_capacity_bytes():
    try:
        info = pltpu.get_tpu_info()
        cap = getattr(info, "vmem_capacity_bytes", None)
        if cap:
            return int(cap)
    except Exception:
        pass
    return 64 * 1024 * 1024  # conservative default (v7x per-TensorCore VMEM)


@functools.lru_cache(maxsize=None)
def _tile_targets():
    cap = _vmem_capacity_bytes()
    if cap >= 96 * 1024 * 1024:
        # v5e / v6e: 128 MiB VMEM -> bigger blocks amortize per-step overhead.
        return {"tm": 512, "tn": 1024, "tk": 256, "tq": 1024, "tkv": 1024}
    # v7x-class: 64 MiB VMEM per TensorCore -> smaller tiles.
    return {"tm": 256, "tn": 512, "tk": 256, "tq": 512, "tkv": 512}


@functools.lru_cache(maxsize=None)
def _vmem_limit_bytes():
    cap = _vmem_capacity_bytes()
    return max(32 * 1024 * 1024, min((cap * 3) // 4, 100 * 1024 * 1024))


def _compiler_params(dimension_semantics):
    return pltpu.CompilerParams(
        dimension_semantics=dimension_semantics,
        vmem_limit_bytes=_vmem_limit_bytes(),
    )


def _pick_tile(dim, target, align):
    """Largest multiple of `align` dividing `dim` that is <= target.

    Returns the full dim if dim <= target (full-extent blocks are always
    layout-legal) or if no aligned divisor exists.
    """
    if dim <= target:
        return dim
    t = (target // align) * align
    while t >= align:
        if dim % t == 0:
            return t
        t -= align
    return dim


# -------------------------------- kernels ----------------------------------- #

def _ln_matmul_kernel(x_ref, g_ref, b_ref, w_ref, bias_ref, o_ref, *, eps, gelu):
    """out = [GELU](LayerNorm(x) @ w + bias); x block carries the FULL channel
    dim so the per-row statistics are exact.  grid = (M//tm, N//tn)."""
    x = x_ref[...]                                          # (tm, C) f32
    mu = jnp.mean(x, axis=-1, keepdims=True)
    xc = x - mu
    var = jnp.mean(xc * xc, axis=-1, keepdims=True)
    xn = xc * jax.lax.rsqrt(var + eps) * g_ref[...] + b_ref[...]
    y = jnp.dot(xn.astype(_MXU_DTYPE), w_ref[...],
                preferred_element_type=jnp.float32) + bias_ref[...]
    if gelu:
        # tanh-approximate GELU (see TODO at top of file).
        y = 0.5 * y * (1.0 + jnp.tanh(0.7978845608028654 * (y + 0.044715 * y * y * y)))
    o_ref[...] = y.astype(o_ref.dtype)


def _matmul_residual_kernel(x_ref, w_ref, bias_ref, res_ref, o_ref):
    """out = residual + x @ w + bias.  grid = (M//tm, N//tn, K//tk), K innermost.

    The f32 output block is resident across the K axis, so it is used directly
    as the accumulator (no VMEM scratch); bias + residual form its K==0 value,
    which fuses the residual add for free."""
    @pl.when(pl.program_id(2) == 0)
    def _():
        o_ref[...] = res_ref[...] + bias_ref[...]

    o_ref[...] += jnp.dot(x_ref[...], w_ref[...], preferred_element_type=jnp.float32)


def _flash_attention_kernel(q_ref, kv_ref, o_ref, m_ref, l_ref, acc_ref, *,
                            num_heads, head_dim):
    """Flash-style attention over the packed qkv buffer.

    grid = (num_windows, S//tq, S//tkv).  q_ref / o_ref blocks are resident
    across the kv axis; m/l/acc scratch holds the online-softmax state per
    head.  The softmax scale is already folded into the q columns of the qkv
    projection, and heads are read/written as contiguous channel slices so no
    HBM transpose is needed on either side."""
    C = num_heads * head_dim
    kv_idx = pl.program_id(2)

    @pl.when(kv_idx == 0)
    def _():
        m_ref[...] = jnp.full(m_ref.shape, -1e30, m_ref.dtype)
        l_ref[...] = jnp.zeros(l_ref.shape, l_ref.dtype)
        acc_ref[...] = jnp.zeros(acc_ref.shape, acc_ref.dtype)

    qx = q_ref[...]        # (tq, 3C) bf16
    kvx = kv_ref[...]      # (tkv, 3C) bf16

    for h in range(num_heads):
        q = qx[:, h * head_dim:(h + 1) * head_dim]                     # (tq, hd)
        k = kvx[:, C + h * head_dim:C + (h + 1) * head_dim]            # (tkv, hd)
        v = kvx[:, 2 * C + h * head_dim:2 * C + (h + 1) * head_dim]    # (tkv, hd)
        # Contract the shared head dim directly (no explicit k transpose).
        s = jax.lax.dot_general(q, k, (((1,), (1,)), ((), ())),
                                preferred_element_type=jnp.float32)    # (tq, tkv)
        m_prev = m_ref[h]                                              # (tq, 1)
        m_new = jnp.maximum(m_prev, jnp.max(s, axis=-1, keepdims=True))
        alpha = jnp.exp(m_prev - m_new)
        p = jnp.exp(s - m_new)
        l_ref[h] = alpha * l_ref[h] + jnp.sum(p, axis=-1, keepdims=True)
        acc_ref[h] = alpha * acc_ref[h] + jnp.dot(
            p.astype(_MXU_DTYPE), v, preferred_element_type=jnp.float32)
        m_ref[h] = m_new

    @pl.when(kv_idx == pl.num_programs(2) - 1)
    def _():
        # Single lane-dense (tq, C) store (heads packed contiguously along C).
        pieces = [acc_ref[h] * pl.reciprocal(l_ref[h], approx=True)
                  for h in range(num_heads)]
        out = pieces[0] if num_heads == 1 else jnp.concatenate(pieces, axis=-1)
        o_ref[...] = out.astype(o_ref.dtype)


# ------------------------------- wrappers ------------------------------------ #

def pallas_ln_linear(x, gamma, beta, w, bias, *, eps=1e-6, gelu=False,
                     out_dtype=jnp.float32):
    """out = [GELU](LayerNorm(x) @ w + bias).  x: (M, C) f32; w: (C, N) bf16."""
    M, C = x.shape
    N = w.shape[1]
    tgt = _tile_targets()
    tm = _pick_tile(M, tgt["tm"], 8)
    tn = _pick_tile(N, tgt["tn"], 128)
    g2 = gamma.reshape(1, C).astype(jnp.float32)
    b2 = beta.reshape(1, C).astype(jnp.float32)
    bias2 = bias.reshape(1, N).astype(jnp.float32)
    kern = functools.partial(_ln_matmul_kernel, eps=eps, gelu=gelu)
    return pl.pallas_call(
        kern,
        out_shape=jax.ShapeDtypeStruct((M, N), out_dtype),
        grid=(M // tm, N // tn),
        in_specs=[
            pl.BlockSpec((tm, C), lambda i, j: (i, 0)),
            pl.BlockSpec((1, C), lambda i, j: (0, 0)),
            pl.BlockSpec((1, C), lambda i, j: (0, 0)),
            pl.BlockSpec((C, tn), lambda i, j: (0, j)),
            pl.BlockSpec((1, tn), lambda i, j: (0, j)),
        ],
        out_specs=pl.BlockSpec((tm, tn), lambda i, j: (i, j)),
        compiler_params=_compiler_params(("parallel", "parallel")),
    )(x, g2, b2, w, bias2)


def pallas_linear_residual(x, w, bias, residual):
    """out = residual + x @ w + bias (f32).  x: (M, K) bf16/f32; w: (K, N) bf16."""
    M, K = x.shape
    N = w.shape[1]
    tgt = _tile_targets()
    tm = _pick_tile(M, tgt["tm"], 8)
    tn = _pick_tile(N, tgt["tn"], 128)
    tk = _pick_tile(K, tgt["tk"], 128)
    bias2 = bias.reshape(1, N).astype(jnp.float32)
    return pl.pallas_call(
        _matmul_residual_kernel,
        out_shape=jax.ShapeDtypeStruct((M, N), jnp.float32),
        grid=(M // tm, N // tn, K // tk),
        in_specs=[
            pl.BlockSpec((tm, tk), lambda i, j, k: (i, k)),
            pl.BlockSpec((tk, tn), lambda i, j, k: (k, j)),
            pl.BlockSpec((1, tn), lambda i, j, k: (0, j)),
            pl.BlockSpec((tm, tn), lambda i, j, k: (i, j)),
        ],
        out_specs=pl.BlockSpec((tm, tn), lambda i, j, k: (i, j)),
        compiler_params=_compiler_params(("parallel", "parallel", "arbitrary")),
    )(x, w, bias2, residual)


def pallas_attention(qkv, num_windows, seq_len, num_heads, head_dim,
                     out_dtype=_MXU_DTYPE):
    """Flash attention over a packed qkv buffer.

    qkv: (num_windows*seq_len, 3*C) bf16, per-token layout [q(C) | k(C) | v(C)]
    with the softmax scale already folded into the q part.
    Returns (num_windows*seq_len, C) with heads packed contiguously along C."""
    C = num_heads * head_dim
    M = num_windows * seq_len
    tgt = _tile_targets()
    tq = _pick_tile(seq_len, tgt["tq"], 16)
    tkv = _pick_tile(seq_len, tgt["tkv"], 16)
    n_q = seq_len // tq
    n_kv = seq_len // tkv
    kern = functools.partial(_flash_attention_kernel,
                             num_heads=num_heads, head_dim=head_dim)
    return pl.pallas_call(
        kern,
        out_shape=jax.ShapeDtypeStruct((M, C), out_dtype),
        grid=(num_windows, n_q, n_kv),
        in_specs=[
            pl.BlockSpec((tq, 3 * C), lambda b, qi, kv: (b * n_q + qi, 0)),
            pl.BlockSpec((tkv, 3 * C), lambda b, qi, kv: (b * n_kv + kv, 0)),
        ],
        out_specs=pl.BlockSpec((tq, C), lambda b, qi, kv: (b * n_q + qi, 0)),
        scratch_shapes=[
            pltpu.VMEM((num_heads, tq, 1), jnp.float32),          # m
            pltpu.VMEM((num_heads, tq, 1), jnp.float32),          # l
            pltpu.VMEM((num_heads, tq, head_dim), jnp.float32),   # acc
        ],
        compiler_params=_compiler_params(("parallel", "parallel", "arbitrary")),
    )(qkv, qkv)


# ------------------------- window partition glue ----------------------------- #

def window_partition(x, window_size):
    """Reference-style window partition (zero padding)."""
    B, H, W, C = x.shape
    pad_h = (window_size - H % window_size) % window_size
    pad_w = (window_size - W % window_size) % window_size
    if pad_h or pad_w:
        x = jnp.pad(x, ((0, 0), (0, pad_h), (0, pad_w), (0, 0)))
    Hp, Wp = H + pad_h, W + pad_w
    x = x.reshape(B, Hp // window_size, window_size, Wp // window_size, window_size, C)
    windows = jnp.transpose(x, (0, 1, 3, 2, 4, 5)).reshape(-1, window_size, window_size, C)
    return windows, (Hp, Wp)


def window_partition_fill(x, window_size, fill):
    """Window partition that pads with a constant per-channel `fill` row.

    Used on the packed qkv buffer: padded tokens get qkv == b_qkv, which is
    exactly what the reference produces for zero-padded normalized inputs."""
    B, H, W, Cx = x.shape
    pad_h = (window_size - H % window_size) % window_size
    pad_w = (window_size - W % window_size) % window_size
    Hp, Wp = H + pad_h, W + pad_w
    if pad_h or pad_w:
        base = jnp.broadcast_to(fill.astype(x.dtype).reshape(1, 1, 1, Cx),
                                (B, Hp, Wp, Cx))
        x = base.at[:, :H, :W, :].set(x)
    x = x.reshape(B, Hp // window_size, window_size, Wp // window_size, window_size, Cx)
    windows = jnp.transpose(x, (0, 1, 3, 2, 4, 5)).reshape(-1, window_size, window_size, Cx)
    return windows, (Hp, Wp)


def window_unpartition(windows, window_size, pad_hw, hw):
    Hp, Wp = pad_hw
    H, W = hw
    B = windows.shape[0] // (Hp // window_size * (Wp // window_size))
    x = windows.reshape(B, Hp // window_size, Wp // window_size, window_size, window_size, -1)
    x = jnp.transpose(x, (0, 1, 3, 2, 4, 5)).reshape(B, Hp, Wp, -1)
    if Hp > H or Wp > W:
        x = x[:, :H, :W, :]
    return x


# ----------------------------- param preparation ----------------------------- #

def prepare_block_params(params, num_heads):
    """Pre-cast matmul weights to bf16 once (outside all pallas_calls) and fold
    the attention softmax scale into the q columns of the qkv projection."""
    C = params["w_qkv"].shape[0]
    head_dim = C // num_heads
    scale = head_dim ** (-0.5)
    w_qkv = params["w_qkv"].astype(jnp.float32).at[:, :C].multiply(scale)
    b_qkv = params["b_qkv"].astype(jnp.float32).at[:C].multiply(scale)
    return {
        "ln1_g": params["ln1_g"].astype(jnp.float32),
        "ln1_b": params["ln1_b"].astype(jnp.float32),
        "ln2_g": params["ln2_g"].astype(jnp.float32),
        "ln2_b": params["ln2_b"].astype(jnp.float32),
        "w_qkv": w_qkv.astype(_MXU_DTYPE),
        "b_qkv": b_qkv,                                    # f32, q part pre-scaled
        "w_proj": params["w_proj"].astype(_MXU_DTYPE),
        "b_proj": params["b_proj"].astype(jnp.float32),
        "w_fc1": params["w_fc1"].astype(_MXU_DTYPE),
        "b_fc1": params["b_fc1"].astype(jnp.float32),
        "w_fc2": params["w_fc2"].astype(_MXU_DTYPE),
        "b_fc2": params["b_fc2"].astype(jnp.float32),
    }


# ------------------------------ module forward ------------------------------- #

def block_forward(x, prep, num_heads, window_size=0):
    """ViT Block forward (use_rel_pos=False, drop_path=0, no residual block).

    Fusion layout:
      LN1+qkv (bf16 out) -> [window partition of qkv] -> flash attention
      -> [window unpartition] -> proj + shortcut (f32) -> LN2+fc1+GELU (bf16)
      -> fc2 + residual (f32).
    """
    B, H, W, C = x.shape
    head_dim = C // num_heads
    M0 = B * H * W
    x2 = x.reshape(M0, C)

    # LayerNorm1 fused into the qkv projection; output stays bf16 (matmul-only).
    qkv = pallas_ln_linear(x2, prep["ln1_g"], prep["ln1_b"],
                           prep["w_qkv"], prep["b_qkv"], out_dtype=_MXU_DTYPE)

    if window_size > 0:
        qkv_w, pad_hw = window_partition_fill(
            qkv.reshape(B, H, W, 3 * C), window_size, prep["b_qkv"])
        num_windows = qkv_w.shape[0]
        S = window_size * window_size
        qkv_w = qkv_w.reshape(num_windows * S, 3 * C)
    else:
        qkv_w, pad_hw = qkv, (H, W)
        num_windows, S = B, H * W

    attn = pallas_attention(qkv_w, num_windows, S, num_heads, head_dim)

    if window_size > 0:
        attn = window_unpartition(
            attn.reshape(num_windows, window_size, window_size, C),
            window_size, pad_hw, (H, W)).reshape(M0, C)

    # proj + shortcut residual fused (output f32 carries the residual).
    x_mid = pallas_linear_residual(attn, prep["w_proj"], prep["b_proj"], x2)

    # LayerNorm2 fused into fc1 (+GELU); fc2 + residual fused.
    h = pallas_ln_linear(x_mid, prep["ln2_g"], prep["ln2_b"],
                         prep["w_fc1"], prep["b_fc1"], gelu=True,
                         out_dtype=_MXU_DTYPE)
    out = pallas_linear_residual(h, prep["w_fc2"], prep["b_fc2"], x_mid)
    return out.reshape(B, H, W, C)


# --------------------------------- reference ---------------------------------- #

def _layernorm_ref(x, g, b, eps=1e-6):
    mu = jnp.mean(x, axis=-1, keepdims=True)
    var = jnp.mean((x - mu) ** 2, axis=-1, keepdims=True)
    return (x - mu) / jnp.sqrt(var + eps) * g + b


def block_reference(x, params, num_heads, window_size=0):
    B, H, W, C = x.shape
    shortcut = x
    xn = _layernorm_ref(x, params["ln1_g"], params["ln1_b"])
    if window_size > 0:
        xw, pad_hw = window_partition(xn, window_size)
    else:
        xw, pad_hw = xn, (H, W)
    Bw, Hw, Ww, _ = xw.shape
    S = Hw * Ww
    hd = C // num_heads
    scale = hd ** (-0.5)
    qkv = xw.reshape(Bw * S, C) @ params["w_qkv"] + params["b_qkv"]
    qkv = qkv.reshape(Bw, S, 3, num_heads, hd)
    qkv = jnp.transpose(qkv, (2, 0, 3, 1, 4)).reshape(3, Bw * num_heads, S, hd)
    q, k, v = qkv[0], qkv[1], qkv[2]
    attn = jax.nn.softmax((q * scale) @ jnp.swapaxes(k, -2, -1), axis=-1)
    out = (attn @ v).reshape(Bw, num_heads, Hw, Ww, hd)
    out = jnp.transpose(out, (0, 2, 3, 1, 4)).reshape(Bw * S, C)
    a = (out @ params["w_proj"] + params["b_proj"]).reshape(Bw, Hw, Ww, C)
    if window_size > 0:
        a = window_unpartition(a, window_size, pad_hw, (H, W))
    x = shortcut + a
    xn2 = _layernorm_ref(x, params["ln2_g"], params["ln2_b"])
    h = jax.nn.gelu(xn2.reshape(-1, C) @ params["w_fc1"] + params["b_fc1"], approximate=False)
    m = h @ params["w_fc2"] + params["b_fc2"]
    return x + m.reshape(B, H, W, C)


# ----------------------------------- main ------------------------------------- #

if __name__ == "__main__":
    key = jax.random.PRNGKey(0)
    ks = jax.random.split(key, 14)

    C, num_heads = 32, 2
    hidden = 4 * C

    params = {
        # weights stored in "x @ W + b" convention (== torch Linear with W^T)
        "ln1_g": 1.0 + 0.1 * jax.random.normal(ks[0], (C,), jnp.float32),
        "ln1_b": 0.1 * jax.random.normal(ks[1], (C,), jnp.float32),
        "w_qkv": 0.02 * jax.random.normal(ks[2], (C, 3 * C), jnp.float32),
        "b_qkv": 0.02 * jax.random.normal(ks[3], (3 * C,), jnp.float32),
        "w_proj": 0.02 * jax.random.normal(ks[4], (C, C), jnp.float32),
        "b_proj": 0.02 * jax.random.normal(ks[5], (C,), jnp.float32),
        "ln2_g": 1.0 + 0.1 * jax.random.normal(ks[6], (C,), jnp.float32),
        "ln2_b": 0.1 * jax.random.normal(ks[7], (C,), jnp.float32),
        "w_fc1": 0.02 * jax.random.normal(ks[8], (C, hidden), jnp.float32),
        "b_fc1": 0.02 * jax.random.normal(ks[9], (hidden,), jnp.float32),
        "w_fc2": 0.02 * jax.random.normal(ks[10], (hidden, C), jnp.float32),
        "b_fc2": 0.02 * jax.random.normal(ks[11], (C,), jnp.float32),
    }

    prep = prepare_block_params(params, num_heads)

    # Test 1: global attention (window_size = 0)
    x1 = jax.random.normal(ks[12], (2, 8, 8, C), dtype=jnp.float32)
    y1 = block_forward(x1, prep, num_heads, window_size=0)
    jax.block_until_ready(y1)
    y1_ref = block_reference(x1, params, num_heads, window_size=0)
    assert y1.shape == x1.shape
    assert jnp.allclose(y1, y1_ref, atol=2e-2, rtol=2e-2), "mismatch (global attention)"

    # Test 2: windowed attention with padding (window_size = 4, H = W = 6)
    x2 = jax.random.normal(ks[13], (2, 6, 6, C), dtype=jnp.float32)
    y2 = block_forward(x2, prep, num_heads, window_size=4)
    jax.block_until_ready(y2)
    y2_ref = block_reference(x2, params, num_heads, window_size=4)
    assert y2.shape == x2.shape
    assert jnp.allclose(y2, y2_ref, atol=2e-2, rtol=2e-2), "mismatch (windowed attention)"

    print("KERNEL_OK")
</pallas_src>

<mosaic_0001>
module attributes {stable_mosaic.version = 11 : i64} {
  func.func @_ln_matmul_kernel(%arg0: i32, %arg1: i32, %arg2: memref<128x32xf32, #tpu.memory_space<vmem>>, %arg3: memref<1x32xf32, #tpu.memory_space<vmem>>, %arg4: memref<1x32xf32, #tpu.memory_space<vmem>>, %arg5: memref<32x96xbf16, #tpu.memory_space<vmem>>, %arg6: memref<1x96xf32, #tpu.memory_space<vmem>>, %arg7: memref<128x96xbf16, #tpu.memory_space<vmem>>) attributes {dimension_semantics = [#tpu.dimension_semantics<parallel>, #tpu.dimension_semantics<parallel>], iteration_bounds = array<i64: 1, 1>, scalar_prefetch = 0 : i64, scratch_operands = 0 : i64, tpu.core_type = #tpu.core_type<tc>, window_params = [{transform_indices = @transform_0, window_bounds = array<i64: 128, 32>}, {pipeline_mode = #tpu.pipeline_mode<synchronous>, transform_indices = @transform_1, window_bounds = array<i64: 1, 32>}, {pipeline_mode = #tpu.pipeline_mode<synchronous>, transform_indices = @transform_2, window_bounds = array<i64: 1, 32>}, {transform_indices = @transform_3, window_bounds = array<i64: 32, 96>}, {transform_indices = @transform_4, window_bounds = array<i64: 1, 96>}, {transform_indices = @transform_5, window_bounds = array<i64: 128, 96>}]} {
    %c0 = arith.constant 0 : index
    %c0_0 = arith.constant 0 : index
    %0 = vector.load %arg2[%c0, %c0_0] : memref<128x32xf32, #tpu.memory_space<vmem>>, vector<128x32xf32>
    %cst = arith.constant dense<0.000000e+00> : vector<128xf32>
    %1 = vector.multi_reduction <add>, %0, %cst [1] : vector<128x32xf32> to vector<128xf32>
    %2 = vector.shape_cast %1 : vector<128xf32> to vector<128x1xf32>
    %cst_1 = arith.constant 3.200000e+01 : f32
    %3 = vector.broadcast %cst_1 : f32 to vector<128x1xf32>
    %4 = arith.divf %2, %3 : vector<128x1xf32>
    %5 = vector.broadcast %4 : vector<128x1xf32> to vector<128x32xf32>
    %6 = arith.subf %0, %5 : vector<128x32xf32>
    %7 = arith.mulf %6, %6 : vector<128x32xf32>
    %cst_2 = arith.constant dense<0.000000e+00> : vector<128xf32>
    %8 = vector.multi_reduction <add>, %7, %cst_2 [1] : vector<128x32xf32> to vector<128xf32>
    %9 = vector.shape_cast %8 : vector<128xf32> to vector<128x1xf32>
    %cst_3 = arith.constant 3.200000e+01 : f32
    %10 = vector.broadcast %cst_3 : f32 to vector<128x1xf32>
    %11 = arith.divf %9, %10 : vector<128x1xf32>
    %cst_4 = arith.constant 9.99999997E-7 : f32
    %12 = vector.broadcast %cst_4 : f32 to vector<128x1xf32>
    %13 = arith.addf %11, %12 : vector<128x1xf32>
    %14 = math.rsqrt %13 : vector<128x1xf32>
    %15 = vector.broadcast %14 : vector<128x1xf32> to vector<128x32xf32>
    %16 = arith.mulf %6, %15 : vector<128x32xf32>
    %c0_5 = arith.constant 0 : index
    %c0_6 = arith.constant 0 : index
    %17 = vector.load %arg3[%c0_5, %c0_6] : memref<1x32xf32, #tpu.memory_space<vmem>>, vector<1x32xf32>
    %18 = vector.broadcast %17 : vector<1x32xf32> to vector<128x32xf32>
    %19 = arith.mulf %16, %18 : vector<128x32xf32>
    %c0_7 = arith.constant 0 : index
    %c0_8 = arith.constant 0 : index
    %20 = vector.load %arg4[%c0_7, %c0_8] : memref<1x32xf32, #tpu.memory_space<vmem>>, vector<1x32xf32>
    %21 = vector.broadcast %20 : vector<1x32xf32> to vector<128x32xf32>
    %22 = arith.addf %19, %21 : vector<128x32xf32>
    %23 = arith.truncf %22 : vector<128x32xf32> to vector<128x32xbf16>
    %c0_9 = arith.constant 0 : index
    %c0_10 = arith.constant 0 : index
    %24 = vector.load %arg5[%c0_9, %c0_10] : memref<32x96xbf16, #tpu.memory_space<vmem>>, vector<32x96xbf16>
    %cst_11 = arith.constant dense<0.000000e+00> : vector<128x96xf32>
    %25 = tpu.matmul %23, %24, %cst_11 {dimension_numbers = #tpu.dot_dimension_numbers<[1], [0], [0], [1], [0, 0, 1, 1], [], []>} : vector<128x32xbf16>, vector<32x96xbf16>, vector<128x96xf32> -> vector<128x96xf32>
    %c0_12 = arith.constant 0 : index
    %c0_13 = arith.constant 0 : index
    %26 = vector.load %arg6[%c0_12, %c0_13] : memref<1x96xf32, #tpu.memory_space<vmem>>, vector<1x96xf32>
    %27 = vector.broadcast %26 : vector<1x96xf32> to vector<128x96xf32>
    %28 = arith.addf %25, %27 : vector<128x96xf32>
    %29 = arith.truncf %28 : vector<128x96xf32> to vector<128x96xbf16>
    %c0_14 = arith.constant 0 : index
    %c0_15 = arith.constant 0 : index
    %30 = vector.load %arg7[%c0_14, %c0_15] : memref<128x96xbf16, #tpu.memory_space<vmem>>, vector<128x96xbf16>
    tpu.vector_store %arg7[%c0_14, %c0_15], %29 {strides = array<i32>} : memref<128x96xbf16, #tpu.memory_space<vmem>>, vector<128x96xbf16>,
    return
  }
  func.func @transform_0(%arg0: i32, %arg1: i32) -> (i32, i32) {
    %c0_i32 = arith.constant 0 : i32
    %c0_i32_0 = arith.constant 0 : i32
    return %arg0, %c0_i32 : i32, i32
  }
  func.func @transform_1(%arg0: i32, %arg1: i32) -> (i32, i32) {
    %c0_i32 = arith.constant 0 : i32
    %c0_i32_0 = arith.constant 0 : i32
    %c0_i32_1 = arith.constant 0 : i32
    return %c0_i32, %c0_i32_0 : i32, i32
  }
  func.func @transform_2(%arg0: i32, %arg1: i32) -> (i32, i32) {
    %c0_i32 = arith.constant 0 : i32
    %c0_i32_0 = arith.constant 0 : i32
    %c0_i32_1 = arith.constant 0 : i32
    return %c0_i32, %c0_i32_0 : i32, i32
  }
  func.func @transform_3(%arg0: i32, %arg1: i32) -> (i32, i32) {
    %c0_i32 = arith.constant 0 : i32
    %c0_i32_0 = arith.constant 0 : i32
    return %c0_i32, %arg1 : i32, i32
  }
  func.func @transform_4(%arg0: i32, %arg1: i32) -> (i32, i32) {
    %c0_i32 = arith.constant 0 : i32
    %c0_i32_0 = arith.constant 0 : i32
    return %c0_i32, %arg1 : i32, i32
  }
  func.func @transform_5(%arg0: i32, %arg1: i32) -> (i32, i32) {
    %c0_i32 = arith.constant 0 : i32
    return %arg0, %arg1 : i32, i32
  }
}

</mosaic_0001>

<bundles_post_ra>
// kernel: tpu_custom_call.1
= control target key start
LH: loop header
LB: loop body
LE: loop exit
PB: predicated region body
PF: predicated region fallthrough
CT: control target
= control target key end

     0   :  { %vm37_vm0 = vcmask 261120   ;;  %vm509_vm1 = vcmask 781312   ;;  %s996_s0 = inlined_call_operand.vmem [shape: f32[128,32], index: 0, kind: input, shape index: {}]   ;;  %s997_s3 = inlined_call_operand.vmem [shape: bf16[32,96], index: 3, kind: input, shape index: {}]   ;;  %s998_s1 = inlined_call_operand.vmem [shape: f32[1,32], index: 1, kind: input, shape index: {}]   ;;  %s999_s2 = inlined_call_operand.vmem [shape: f32[1,32], index: 2, kind: input, shape index: {}]   ;;  %s1000_s4 = inlined_call_operand.vmem [shape: f32[1,96], index: 4, kind: input, shape index: {}]   ;;  %s1001_s5 = inlined_call_operand.vmem [shape: bf16[128,96], index: 5, kind: output, shape index: {}]  }
   0x1   :  { %v21_v0 = vld [vmem:[%s996_s0] sm:$0xff]  ;;  %v22_v2 = vld [vmem:[%s996_s0 + $0x8] sm:$0xff]  ;;  %v23_v8 = vld [vmem:[%s996_s0 + $0x10] sm:$0xff] }
   0x2   :  { %v29_v1 = vld [vmem:[%s996_s0 + $0x40] sm:$0xff]  ;;  %v38_v3 = vsel %vm37_vm0, %v21_v0, 0.0  ;;  %v30_v5 = vld [vmem:[%s996_s0 + $0x48] sm:$0xff]  ;;  %v41_v6 = vsel %vm37_vm0, %v22_v2, 0.0  ;;  %v24_v9 = vld [vmem:[%s996_s0 + $0x18] sm:$0xff]  ;;  %v44_v10 = vsel %vm37_vm0, %v23_v8, 0.0 }
   0x3   :  { %v62_v4 = vsel %vm37_vm0, %v29_v1, 0.0  ;;  %39 = vadd.xlane.f32.xlu0 %v38_v3  ;;  %v65_v7 = vsel %vm37_vm0, %v30_v5, 0.0  ;;  %v47_v11 = vsel %vm37_vm0, %v24_v9, 0.0  ;;  %v700_v12 = vld [vmem:[%s996_s0 + $0x50] sm:$0xff]  ;;  %v705_v13 = vld [vmem:[%s996_s0 + $0x58] sm:$0xff]  ;;  %v714_v16 = vld [vmem:[%s996_s0 + $0x20] sm:$0xff] }
   0x4   :  { %63 = vadd.xlane.f32.xlu1 %v62_v4  ;;  %v68_v14 = vsel %vm37_vm0, %v700_v12, 0.0  ;;  %v71_v15 = vsel %vm37_vm0, %v705_v13, 0.0  ;;  %v719_v17 = vld [vmem:[%s996_s0 + $0x28] sm:$0xff]  ;;  %v50_v18 = vsel %vm37_vm0, %v714_v16, 0.0  ;;  %v728_v20 = vld [vmem:[%s996_s0 + $0x60] sm:$0xff]  ;;  %v742_v24 = vld [vmem:[%s996_s0 + $0x30] sm:$0xff] }
   0x5   :  { %v53_v19 = vsel %vm37_vm0, %v719_v17, 0.0  ;;  %v733_v21 = vld [vmem:[%s996_s0 + $0x68] sm:$0xff]  ;;  %v74_v22 = vsel %vm37_vm0, %v728_v20, 0.0  ;;  %v747_v25 = vld [vmem:[%s996_s0 + $0x38] sm:$0xff]  ;;  %v56_v26 = vsel %vm37_vm0, %v742_v24, 0.0  ;;  %v756_v28 = vld [vmem:[%s996_s0 + $0x70] sm:$0xff] }
   0x6   :  { %v77_v23 = vsel %vm37_vm0, %v733_v21, 0.0  ;;  %v59_v27 = vsel %vm37_vm0, %v747_v25, 0.0  ;;  %v761_v29 = vld [vmem:[%s996_s0 + $0x78] sm:$0xff]  ;;  %v80_v30 = vsel %vm37_vm0, %v756_v28, 0.0 }
   0x7   :  { %42 = vadd.xlane.f32.xlu0 %v41_v6  ;;  %v83_v31 = vsel %vm37_vm0, %v761_v29, 0.0 }
   0x8   :  { %66 = vadd.xlane.f32.xlu1 %v65_v7 }
   0xb   :  { %45 = vadd.xlane.f32.xlu0 %v44_v10 }
   0xc   :  { %48 = vadd.xlane.f32.xlu1 %v47_v11 }
   0xf   :  { %69 = vadd.xlane.f32.xlu0 %v68_v14 }
  0x10   :  { %72 = vadd.xlane.f32.xlu1 %v71_v15 }
  0x13   :  { %51 = vadd.xlane.f32.xlu0 %v50_v18 }
  0x14   :  { %54 = vadd.xlane.f32.xlu1 %v53_v19 }
  0x17   :  { %75 = vadd.xlane.f32.xlu0 %v74_v22 }
  0x18   :  { %78 = vadd.xlane.f32.xlu1 %v77_v23 }
  0x1b   :  { %57 = vadd.xlane.f32.xlu0 %v56_v26 }
  0x1c   :  { %60 = vadd.xlane.f32.xlu1 %v59_v27 }
  0x1f   :  { %81 = vadd.xlane.f32.xlu0 %v80_v30 }
  0x20   :  { %84 = vadd.xlane.f32.xlu1 %v83_v31 }
  0x90   :  { %v40_v32 = vpop.xlane.xlu0 %39 }
  0x91   :  { %v64_v33 = vpop.xlane.xlu1 %63  ;;  %v87_v34 = vmul.f32 0.03125, %v40_v32 }
  0x92   :  { %v95_v35 = vmul.f32 0.03125, %v64_v33 }
  0x93   :  { %v767_v36 = vsub.f32 %v21_v0, %v87_v34 }
  0x94   :  { %v769_v37 = vsub.f32 %v29_v1, %v95_v35  ;;  %v43_v38 = vpop.xlane.xlu0 %42 }
  0x95   :  { %v67_v39 = vpop.xlane.xlu1 %66  ;;  %v88_v40 = vmul.f32 0.03125, %v43_v38  ;;  %v119_v42 = vmul.f32 %v767_v36, %v767_v36 }
  0x96   :  { %v96_v41 = vmul.f32 0.03125, %v67_v39  ;;  %v127_v43 = vmul.f32 %v769_v37, %v769_v37 }
  0x97   :  { %v775_v44 = vsub.f32 %v22_v2, %v88_v40  ;;  %v135_v46 = vsel %vm37_vm0, %v119_v42, 0.0 }
  0x98   :  { %v777_v45 = vsub.f32 %v30_v5, %v96_v41  ;;  %136 = vadd.xlane.f32.xlu0 %v135_v46  ;;  %v46_v47 = vpop.xlane.xlu0 %45  ;;  %v159_v49 = vsel %vm37_vm0, %v127_v43, 0.0 }
  0x99   :  { %v49_v48 = vpop.xlane.xlu1 %48  ;;  %v89_v50 = vmul.f32 0.03125, %v46_v47  ;;  %v120_v52 = vmul.f32 %v775_v44, %v775_v44 }
  0x9a   :  { %v90_v51 = vmul.f32 0.03125, %v49_v48  ;;  %v128_v53 = vmul.f32 %v777_v45, %v777_v45 }
  0x9b   :  { %v785_v54 = vsub.f32 %v23_v8, %v89_v50  ;;  %v138_v56 = vsel %vm37_vm0, %v120_v52, 0.0 }
  0x9c   :  { %v787_v55 = vsub.f32 %v24_v9, %v90_v51  ;;  %160 = vadd.xlane.f32.xlu0 %v159_v49  ;;  %139 = vadd.xlane.f32.xlu1 %v138_v56  ;;  %v70_v57 = vpop.xlane.xlu0 %69  ;;  %v162_v59 = vsel %vm37_vm0, %v128_v53, 0.0  ;;  %v610_v53 = vld [vmem:[%s997_s3 + $0x8] sm:$0xff]  }
  0x9d   :  { %v73_v58 = vpop.xlane.xlu1 %72  ;;  %v97_v60 = vmul.f32 0.03125, %v70_v57  ;;  %v121_v62 = vmul.f32 %v785_v54, %v785_v54 }
  0x9e   :  { %v98_v61 = vmul.f32 0.03125, %v73_v58  ;;  %v122_v63 = vmul.f32 %v787_v55, %v787_v55 }
  0x9f   :  { %v796_v0 = vsub.f32 %v700_v12, %v97_v60  ;;  %v141_v2 = vsel %vm37_vm0, %v121_v62, 0.0 }
  0xa0   :  { %v799_v1 = vsub.f32 %v705_v13, %v98_v61  ;;  %163 = vadd.xlane.f32.xlu1 %v162_v59  ;;  %142 = vadd.xlane.f32.xlu0 %v141_v2  ;;  %v52_v3 = vpop.xlane.xlu0 %51  ;;  %v144_v5 = vsel %vm37_vm0, %v122_v63, 0.0 }
  0xa1   :  { %v55_v4 = vpop.xlane.xlu1 %54  ;;  %v91_v6 = vmul.f32 0.03125, %v52_v3  ;;  %v129_v8 = vmul.f32 %v796_v0, %v796_v0 }
  0xa2   :  { %v92_v7 = vmul.f32 0.03125, %v55_v4  ;;  %v130_v9 = vmul.f32 %v799_v1, %v799_v1 }
  0xa3   :  { %v808_v10 = vsub.f32 %v714_v16, %v91_v6  ;;  %v165_v12 = vsel %vm37_vm0, %v129_v8, 0.0 }
  0xa4   :  { %v811_v11 = vsub.f32 %v719_v17, %v92_v7  ;;  %145 = vadd.xlane.f32.xlu1 %v144_v5  ;;  %166 = vadd.xlane.f32.xlu0 %v165_v12  ;;  %v76_v13 = vpop.xlane.xlu0 %75  ;;  %v168_v15 = vsel %vm37_vm0, %v130_v9, 0.0 }
  0xa5   :  { %v79_v14 = vpop.xlane.xlu1 %78  ;;  %v99_v18 = vmul.f32 0.03125, %v76_v13  ;;  %v123_v22 = vmul.f32 %v808_v10, %v808_v10 }
  0xa6   :  { %v100_v19 = vmul.f32 0.03125, %v79_v14  ;;  %v124_v16 = vmul.f32 %v811_v11, %v811_v11 }
  0xa7   :  { %v820_v23 = vsub.f32 %v728_v20, %v99_v18  ;;  %v147_v26 = vsel %vm37_vm0, %v123_v22, 0.0 }
  0xa8   :  { %v823_v17 = vsub.f32 %v733_v21, %v100_v19  ;;  %169 = vadd.xlane.f32.xlu1 %v168_v15  ;;  %148 = vadd.xlane.f32.xlu0 %v147_v26  ;;  %v58_v27 = vpop.xlane.xlu0 %57  ;;  %v150_v31 = vsel %vm37_vm0, %v124_v16, 0.0 }
  0xa9   :  { %v61_v30 = vpop.xlane.xlu1 %60  ;;  %v93_v32 = vmul.f32 0.03125, %v58_v27  ;;  %v131_v34 = vmul.f32 %v820_v23, %v820_v23 }
  0xaa   :  { %v94_v33 = vmul.f32 0.03125, %v61_v30  ;;  %v132_v20 = vmul.f32 %v823_v17, %v823_v17 }
  0xab   :  { %v832_v35 = vsub.f32 %v742_v24, %v93_v32  ;;  %v171_v38 = vsel %vm37_vm0, %v131_v34, 0.0 }
  0xac   :  { %v835_v21 = vsub.f32 %v747_v25, %v94_v33  ;;  %151 = vadd.xlane.f32.xlu1 %v150_v31  ;;  %172 = vadd.xlane.f32.xlu0 %v171_v38  ;;  %v82_v39 = vpop.xlane.xlu0 %81  ;;  %v174_v41 = vsel %vm37_vm0, %v132_v20, 0.0  ;;  %v867_v31 = vld [vmem:[%s998_s1] ss:$0 sm:$0xff] }
  0xad   :  { %v85_v40 = vpop.xlane.xlu1 %84  ;;  %v101_v42 = vmul.f32 0.03125, %v82_v39  ;;  %v125_v46 = vmul.f32 %v832_v35, %v832_v35 }
  0xae   :  { %v102_v43 = vmul.f32 0.03125, %v85_v40  ;;  %v126_v24 = vmul.f32 %v835_v21, %v835_v21 }
  0xaf   :  { %v844_v47 = vsub.f32 %v756_v28, %v101_v42  ;;  %v153_v48 = vsel %vm37_vm0, %v125_v46, 0.0 }
  0xb0   :  { %v847_v25 = vsub.f32 %v761_v29, %v102_v43  ;;  %175 = vadd.xlane.f32.xlu1 %v174_v41  ;;  %154 = vadd.xlane.f32.xlu0 %v153_v48  ;;  %v156_v49 = vsel %vm37_vm0, %v126_v24, 0.0  ;;  %v609_v29 = vld [vmem:[%s997_s3] sm:$0xff]  }
  0xb1   :  { %v133_v50 = vmul.f32 %v844_v47, %v844_v47  ;;  %585 = vmatprep.subr.bf16.mxu0 %v609_v29  ;;  %605 = vmatprep.subr.bf16.mxu1 %v609_v29  ;;  %v874_v43 = vld [vmem:[%s999_s2] ss:$0 sm:$0xff] }
  0xb2   :  { %v134_v51 = vmul.f32 %v847_v25, %v847_v25  ;;  %586 = vmatpush3.bf16.msra.mxu0 %v609_v29  ;;  %607 = vmatpush3.bf16.msra.mxu1 %v609_v29 }
  0xb3   :  { %v177_v52 = vsel %vm37_vm0, %v133_v50, 0.0  ;;  %587 = vmatprep.subr.bf16.mxu0 %v610_v53  ;;  %606 = vmatprep.subr.bf16.mxu1 %v610_v53 }
  0xb4   :  { %157 = vadd.xlane.f32.xlu1 %v156_v49  ;;  %178 = vadd.xlane.f32.xlu0 %v177_v52  ;;  %v180_v28 = vsel %vm37_vm0, %v134_v51, 0.0 }
  0xb6   :  { %588 = vmatpush3.bf16.msra.mxu0 %v610_v53  ;;  %608 = vmatpush3.bf16.msra.mxu1 %v610_v53 }
  0xb8   :  { %181 = vadd.xlane.f32.xlu1 %v180_v28 }
 0x125   :  { %v137_v56 = vpop.xlane.xlu0 %136 }
 0x126   :  { %v183_v57 = vmul.f32 0.03125, %v137_v56 }
 0x128   :  { %v199_v58 = vadd.f32 1e-06, %v183_v57 }
 0x129   :  { %v140_v59 = vpop.xlane.xlu1 %139  ;;  %v161_v60 = vpop.xlane.xlu0 %160 }
 0x12a   :  { %611 = vrsqrt.f32 %v199_v58  ;;  %v184_v61 = vmul.f32 0.03125, %v140_v59  ;;  %v191_v62 = vmul.f32 0.03125, %v161_v60 }
 0x12c   :  { %v200_v63 = vadd.f32 1e-06, %v184_v61  ;;  %v207_v2 = vadd.f32 1e-06, %v191_v62 }
 0x12d   :  { %v164_v3 = vpop.xlane.xlu1 %163  ;;  %v143_v4 = vpop.xlane.xlu0 %142 }
 0x12e   :  { %613 = vrsqrt.f32 %v200_v63  ;;  %v192_v5 = vmul.f32 0.03125, %v164_v3  ;;  %v185_v6 = vmul.f32 0.03125, %v143_v4 }
 0x12f   :  { %615 = vrsqrt.f32 %v207_v2 }
 0x130   :  { %v208_v7 = vadd.f32 1e-06, %v192_v5  ;;  %v201_v8 = vadd.f32 1e-06, %v185_v6 }
 0x131   :  { %v146_v9 = vpop.xlane.xlu1 %145  ;;  %v167_v12 = vpop.xlane.xlu0 %166 }
 0x132   :  { %617 = vrsqrt.f32 %v208_v7  ;;  %v186_v13 = vmul.f32 0.03125, %v146_v9  ;;  %v193_v14 = vmul.f32 0.03125, %v167_v12 }
 0x133   :  { %619 = vrsqrt.f32 %v201_v8 }
 0x134   :  { %v612_v15 = vpop.eup %611  ;;  %v202_v18 = vadd.f32 1e-06, %v186_v13  ;;  %v209_v19 = vadd.f32 1e-06, %v193_v14 }
 0x135   :  { %v170_v22 = vpop.xlane.xlu1 %169  ;;  %v149_v16 = vpop.xlane.xlu0 %148  ;;  %v231_v26 = vmul.f32 %v612_v15, %v767_v36 }
 0x136   :  { %621 = vrsqrt.f32 %v202_v18  ;;  %v194_v27 = vmul.f32 0.03125, %v170_v22  ;;  %v187_v30 = vmul.f32 0.03125, %v149_v16 }
 0x137   :  { %623 = vrsqrt.f32 %v209_v19  ;;  %v254_v41 = vmul.f32 %v867_v31, %v231_v26 }
 0x138   :  { %v614_v32 = vpop.eup %613  ;;  %v210_v33 = vadd.f32 1e-06, %v194_v27  ;;  %v203_v34 = vadd.f32 1e-06, %v187_v30 }
 0x139   :  { %v616_v20 = vpop.eup %615  ;;  %v152_v38 = vpop.xlane.xlu1 %151  ;;  %v232_v40 = vmul.f32 %v614_v32, %v775_v44  ;;  %v277_v28 = vadd.f32 %v874_v43, %v254_v41 }
 0x13a   :  { %v173_v39 = vpop.xlane.xlu0 %172  ;;  %625 = vrsqrt.f32 %v210_v33  ;;  %v188_v36 = vmul.f32 0.03125, %v152_v38  ;;  %v239_v46 = vmul.f32 %v616_v20, %v769_v37 }
 0x13b   :  { %v195_v42 = vmul.f32 0.03125, %v173_v39  ;;  %627 = vrsqrt.f32 %v203_v34  ;;  %v255_v24 = vmul.f32 %v867_v31, %v232_v40 }
 0x13c   :  { %v618_v48 = vpop.eup %617  ;;  %v204_v49 = vadd.f32 1e-06, %v188_v36  ;;  %v262_v56 = vmul.f32 %v867_v31, %v239_v46 }
 0x13d   :  { %v211_v50 = vadd.f32 1e-06, %v195_v42  ;;  %v620_v51 = vpop.eup %619  ;;  %v176_v44 = vpop.xlane.xlu1 %175  ;;  %v278_v29 = vadd.f32 %v874_v43, %v255_v24  ;;  %v240_v53 = vmul.f32 %v618_v48, %v777_v45 }
 0x13e   :  { %v155_v52 = vpop.xlane.xlu0 %154  ;;  %v233_v57 = vmul.f32 %v620_v51, %v785_v54  ;;  %629 = vrsqrt.f32 %v204_v49  ;;  %v196_v37 = vmul.f32 0.03125, %v176_v44  ;;  %v285_v5 = vadd.f32 %v874_v43, %v262_v56 }
 0x13f   :  { %v189_v58 = vmul.f32 0.03125, %v155_v52  ;;  %631 = vrsqrt.f32 %v211_v50  ;;  %v293_v59 = vpack.c.bf16 %v278_v29, %v277_v28  ;;  %v263_v60 = vmul.f32 %v867_v31, %v240_v53 }
 0x140   :  { %v622_v61 = vpop.eup %621  ;;  %v212_v62 = vadd.f32 1e-06, %v196_v37  ;;  %v256_v6 = vmul.f32 %v867_v31, %v233_v57 }
 0x141   :  { %v205_v63 = vadd.f32 1e-06, %v189_v58  ;;  %v624_v2 = vpop.eup %623  ;;  %v234_v3 = vmul.f32 %v622_v61, %v787_v55  ;;  %v158_v4 = vpop.xlane.xlu1 %157  ;;  %589 = vmatprep.mubr.msk.bf16.mxu0 %vm37_vm0, %v293_v59  ;;  %v286_v54 = vadd.f32 %v874_v43, %v263_v60 }
 0x142   :  { %v179_v45 = vpop.xlane.xlu0 %178  ;;  %v241_v7 = vmul.f32 %v624_v2, %v796_v0  ;;  %633 = vrsqrt.f32 %v212_v62  ;;  %v190_v8 = vmul.f32 0.03125, %v158_v4  ;;  %v279_v16 = vadd.f32 %v874_v43, %v256_v6 }
 0x143   :  { %v197_v9 = vmul.f32 0.03125, %v179_v45  ;;  %635 = vrsqrt.f32 %v205_v63  ;;  %v297_v12 = vpack.c.bf16 %v286_v54, %v285_v5  ;;  %v257_v13 = vmul.f32 %v867_v31, %v234_v3 }
 0x144   :  { %v626_v55 = vpop.eup %625  ;;  %v206_v14 = vadd.f32 1e-06, %v190_v8  ;;  %v264_v26 = vmul.f32 %v867_v31, %v241_v7 }
 0x145   :  { %v213_v15 = vadd.f32 1e-06, %v197_v9  ;;  %v628_v18 = vpop.eup %627  ;;  %v242_v19 = vmul.f32 %v626_v55, %v799_v1  ;;  %v182_v22 = vpop.xlane.xlu1 %181  ;;  %597 = vmatprep.mubr.msk.bf16.mxu1 %vm37_vm0, %v297_v12  ;;  %v280_v0 = vadd.f32 %v874_v43, %v257_v13 }
 0x146   :  { %v235_v27 = vmul.f32 %v628_v18, %v808_v10  ;;  %637 = vrsqrt.f32 %v206_v14  ;;  %v198_v30 = vmul.f32 0.03125, %v182_v22  ;;  %v287_v39 = vadd.f32 %v874_v43, %v264_v26 }
 0x147   :  { %639 = vrsqrt.f32 %v213_v15  ;;  %v294_v32 = vpack.c.bf16 %v280_v0, %v279_v16  ;;  %v265_v33 = vmul.f32 %v867_v31, %v242_v19 }
 0x148   :  { %v630_v34 = vpop.eup %629  ;;  %v214_v20 = vadd.f32 1e-06, %v198_v30  ;;  %v258_v41 = vmul.f32 %v867_v31, %v235_v27 }
 0x149   :  { %v632_v1 = vpop.eup %631  ;;  %v236_v38 = vmul.f32 %v630_v34, %v811_v11  ;;  %590 = vmatmul.mubr.msk.bf16.vlgmr.msra.gmra.mrb[0].mxu0 %vm37_vm0, %v294_v32  ;;  %v288_v40 = vadd.f32 %v874_v43, %v265_v33 }
 0x14a   :  { %v243_v10 = vmul.f32 %v632_v1, %v820_v23  ;;  %641 = vrsqrt.f32 %v214_v20  ;;  %v281_v11 = vadd.f32 %v874_v43, %v258_v41 }
 0x14b   :  { %v298_v36 = vpack.c.bf16 %v288_v40, %v287_v39  ;;  %v259_v42 = vmul.f32 %v867_v31, %v236_v38 }
 0x14c   :  { %v634_v46 = vpop.eup %633  ;;  %v266_v50 = vmul.f32 %v867_v31, %v243_v10 }
 0x14d   :  { %v636_v24 = vpop.eup %635  ;;  %v244_v48 = vmul.f32 %v634_v46, %v823_v17  ;;  %598 = vmatmul.mubr.msk.bf16.vlgmr.msra.gmra.mrb[0].mxu1 %vm37_vm0, %v298_v36  ;;  %v282_v49 = vadd.f32 %v874_v43, %v259_v42 }
 0x14e   :  { %v237_v51 = vmul.f32 %v636_v24, %v832_v35  ;;  %v289_v17 = vadd.f32 %v874_v43, %v266_v50 }
 0x14f   :  { %v295_v44 = vpack.c.bf16 %v282_v49, %v281_v11  ;;  %v267_v23 = vmul.f32 %v867_v31, %v244_v48 }
 0x150   :  { %v638_v52 = vpop.eup %637  ;;  %v260_v56 = vmul.f32 %v867_v31, %v237_v51 }
 0x151   :  { %v640_v28 = vpop.eup %639  ;;  %v238_v29 = vmul.f32 %v638_v52, %v835_v21  ;;  %593 = vmatprep.mubr.msk.bf16.mxu0 %vm37_vm0, %v295_v44  ;;  %v290_v53 = vadd.f32 %v874_v43, %v267_v23 }
 0x152   :  { %v245_v57 = vmul.f32 %v640_v28, %v844_v47  ;;  %v283_v21 = vadd.f32 %v874_v43, %v260_v56 }
 0x153   :  { %v299_v37 = vpack.c.bf16 %v290_v53, %v289_v17  ;;  %v261_v35 = vmul.f32 %v867_v31, %v238_v29 }
 0x154   :  { %v642_v58 = vpop.eup %641  ;;  %v268_v61 = vmul.f32 %v867_v31, %v245_v57 }
 0x155   :  { %v246_v59 = vmul.f32 %v642_v58, %v847_v25  ;;  %601 = vmatprep.mubr.msk.bf16.mxu1 %vm37_vm0, %v299_v37  ;;  %v284_v60 = vadd.f32 %v874_v43, %v261_v35  ;;  %v532_v25 = vld [vmem:[%s1000_s4] ss:$0 sm:$0xff] }
 0x156   :  { %v291_v47 = vadd.f32 %v874_v43, %v268_v61 }
 0x157   :  { %v296_v62 = vpack.c.bf16 %v284_v60, %v283_v21  ;;  %v269_v63 = vmul.f32 %v867_v31, %v246_v59 }
 0x159   :  { %594 = vmatmul.mubr.msk.bf16.gmra.mrb[4].mxu0 %vm37_vm0, %v296_v62  ;;  %v292_v2 = vadd.f32 %v874_v43, %v269_v63 }
 0x15b   :  { %v300_v3 = vpack.c.bf16 %v292_v2, %v291_v47 }
 0x15d   :  { %602 = vmatmul.mubr.msk.bf16.gmra.mrb[4].mxu1 %vm37_vm0, %v300_v3 }
 0x21c   :  { %v591_v4 = vpop.f32.mrb[0].mxu0 }
 0x21d   :  { %v391_v45 = vadd.f32 %v591_v4, %v532_v25  ;;  %v382_v5 = vpop.f32.mrb[1].mxu0 }
 0x21e   :  { %v383_v54 = vadd.f32 %v532_v25, %v382_v5  ;;  %v592_v6 = vpop.f32.mrb[2].mxu0 }
 0x21f   :  { %v561_v31 = vpack.c.bf16 %v391_v45, %v391_v45  ;;  %v394_v7 = vadd.f32 %v592_v6, %v532_v25  ;;  %v385_v8 = vpop.f32.mrb[3].mxu0 }
 0x220   :  { %v559_v9 = vpack.c.bf16 %v383_v54, %v383_v54  ;;  %v386_v12 = vadd.f32 %v532_v25, %v385_v8  ;;  %v599_v13 = vpop.f32.mrb[0].mxu1 }
 0x221   :  { %512 = vst.msk [vmem:[%s1001_s5 + $0x8] sm:$0xf] %vm509_vm1, %v561_v31  ;;  %v562_v43 = vpack.c.bf16 %v394_v7, %v394_v7  ;;  %v423_v55 = vadd.f32 %v599_v13, %v532_v25  ;;  %v414_v14 = vpop.f32.mrb[1].mxu1 }
 0x222   :  { %510 = vst.msk [vmem:[%s1001_s5] sm:$0xf] %vm509_vm1, %v559_v9  ;;  %v560_v15 = vpack.c.bf16 %v386_v12, %v386_v12  ;;  %v415_v18 = vadd.f32 %v532_v25, %v414_v14  ;;  %v600_v19 = vpop.f32.mrb[2].mxu1 }
 0x223   :  { %513 = vst.msk [vmem:[%s1001_s5 + $0xc] sm:$0xf] %vm509_vm1, %v562_v43  ;;  %v569_v22 = vpack.c.bf16 %v423_v55, %v423_v55  ;;  %v426_v16 = vadd.f32 %v600_v19, %v532_v25  ;;  %v417_v0 = vpop.f32.mrb[3].mxu1 }
 0x224   :  { %511 = vst.msk [vmem:[%s1001_s5 + $0x4] sm:$0xf] %vm509_vm1, %v560_v15  ;;  %v567_v26 = vpack.c.bf16 %v415_v18, %v415_v18  ;;  %v418_v27 = vadd.f32 %v532_v25, %v417_v0 }
 0x225   :  { %520 = vst.msk [vmem:[%s1001_s5 + $0x28] sm:$0xf] %vm509_vm1, %v569_v22  ;;  %v570_v30 = vpack.c.bf16 %v426_v16, %v426_v16 }
 0x226   :  { %518 = vst.msk [vmem:[%s1001_s5 + $0x20] sm:$0xf] %vm509_vm1, %v567_v26  ;;  %v568_v32 = vpack.c.bf16 %v418_v27, %v418_v27 }
 0x227   :  { %521 = vst.msk [vmem:[%s1001_s5 + $0x2c] sm:$0xf] %vm509_vm1, %v570_v30 }
 0x228   :  { %519 = vst.msk [vmem:[%s1001_s5 + $0x24] sm:$0xf] %vm509_vm1, %v568_v32 }
 0x22c   :  { %v595_v33 = vpop.f32.mrb[4].mxu0 }
 0x22d   :  { %v407_v34 = vadd.f32 %v595_v33, %v532_v25  ;;  %v398_v20 = vpop.f32.mrb[5].mxu0 }
 0x22e   :  { %v399_v1 = vadd.f32 %v532_v25, %v398_v20  ;;  %v596_v38 = vpop.f32.mrb[6].mxu0 }
 0x22f   :  { %v565_v39 = vpack.c.bf16 %v407_v34, %v407_v34  ;;  %v410_v40 = vadd.f32 %v596_v38, %v532_v25  ;;  %v401_v41 = vpop.f32.mrb[7].mxu0 }
 0x230   :  { %v563_v10 = vpack.c.bf16 %v399_v1, %v399_v1  ;;  %v402_v36 = vadd.f32 %v532_v25, %v401_v41  ;;  %v603_v42 = vpop.f32.mrb[4].mxu1 }
 0x231   :  { %516 = vst.msk [vmem:[%s1001_s5 + $0x18] sm:$0xf] %vm509_vm1, %v565_v39  ;;  %v566_v46 = vpack.c.bf16 %v410_v40, %v410_v40  ;;  %v439_v24 = vadd.f32 %v603_v42, %v532_v25  ;;  %v430_v48 = vpop.f32.mrb[5].mxu1 }
 0x232   :  { %514 = vst.msk [vmem:[%s1001_s5 + $0x10] sm:$0xf] %vm509_vm1, %v563_v10  ;;  %v564_v11 = vpack.c.bf16 %v402_v36, %v402_v36  ;;  %v431_v49 = vadd.f32 %v532_v25, %v430_v48  ;;  %v604_v50 = vpop.f32.mrb[6].mxu1 }
 0x233   :  { %517 = vst.msk [vmem:[%s1001_s5 + $0x1c] sm:$0xf] %vm509_vm1, %v566_v46  ;;  %v573_v51 = vpack.c.bf16 %v439_v24, %v439_v24  ;;  %v442_v44 = vadd.f32 %v604_v50, %v532_v25  ;;  %v433_v23 = vpop.f32.mrb[7].mxu1 }
 0x234   :  { %515 = vst.msk [vmem:[%s1001_s5 + $0x14] sm:$0xf] %vm509_vm1, %v564_v11  ;;  %v571_v52 = vpack.c.bf16 %v431_v49, %v431_v49  ;;  %v434_v28 = vadd.f32 %v532_v25, %v433_v23 }
 0x235   :  { %524 = vst.msk [vmem:[%s1001_s5 + $0x38] sm:$0xf] %vm509_vm1, %v573_v51  ;;  %v574_v29 = vpack.c.bf16 %v442_v44, %v442_v44 }
 0x236   :  { %522 = vst.msk [vmem:[%s1001_s5 + $0x30] sm:$0xf] %vm509_vm1, %v571_v52  ;;  %v572_v17 = vpack.c.bf16 %v434_v28, %v434_v28 }
 0x237   :  { %525 = vst.msk [vmem:[%s1001_s5 + $0x3c] sm:$0xf] %vm509_vm1, %v574_v29 }
 0x238   :  { %523 = vst.msk [vmem:[%s1001_s5 + $0x34] sm:$0xf] %vm509_vm1, %v572_v17 }

</bundles_post_ra>
